<compile_context>
chip_gen: v6e
topology: v6e:2x2x1
jax: 0.10.0
libtpu: 0.0.40
codegen_flags: <defaults>
</compile_context>

<pallas_src>
import functools
import math

import jax
import jax.numpy as jnp
from jax.experimental import pallas as pl
from jax.experimental.pallas import tpu as pltpu

_NEG_LARGE = -1e30  # bias for padded vocab columns; exp() underflows to 0.


def _round_up(x, m):
    return ((x + m - 1) // m) * m


def _cdiv(a, b):
    return (a + b - 1) // b


def _detect_vmem_bytes(default=64 * 1024 * 1024):
    """Physical VMEM per TensorCore; conservative 64 MiB (v7x) fallback."""
    try:
        info = pltpu.get_tpu_info()
        for attr in ("vmem_capacity_bytes", "vmem_size_bytes", "vmem_bytes"):
            val = getattr(info, attr, None)
            if val:
                return int(val)
    except Exception:
        pass
    return default


def _vmem_limit(resident_bytes, vmem_cap):
    limit = max(resident_bytes + (8 << 20), 32 << 20)
    return int(min(limit, int(0.92 * vmem_cap)))


def _choose_tm(fits, tm_cap):
    """Largest row tile (multiple of 16, halving steps) satisfying `fits`."""
    tm = max(16, _round_up(tm_cap, 16))
    while True:
        if fits(tm):
            return tm
        if tm <= 16:
            return None
        tm = max(16, _round_up(tm // 2, 16))


def _maybe_split_rows(tm, m16):
    """Prefer >= 2 row tiles so both TensorCores get work (megacore / v7x)."""
    if tm >= m16 and m16 >= 64:
        return max(16, _round_up(_cdiv(m16, 2), 16))
    return tm


# --------------------------------------------------------------------------
# Kernels
# --------------------------------------------------------------------------
def _oneshot_kernel(x_ref, w_ref, b_ref, o_ref):
    """Full weight resident in VMEM: plain log-softmax over the whole row."""
    logits = (
        jnp.dot(x_ref[...], w_ref[...], preferred_element_type=jnp.float32)
        + b_ref[...]
    )
    m = jnp.max(logits, axis=-1, keepdims=True)
    lse = m + jnp.log(jnp.sum(jnp.exp(logits - m), axis=-1, keepdims=True))
    o_ref[...] = (logits - lse).astype(o_ref.dtype)


def _stream_kernel(x_ref, w_ref, b_ref, o_ref, m_scr, l_scr, *, tn,
                   n_vocab_tiles):
    """Streamed weight, resident (tm, V_pad) output block, online LSE.

    Raw logits for vocab tile j go straight into the resident output block
    (no stash copy); the last vocab step subtracts the LSE in place with a
    single full-width op.
    """
    j = pl.program_id(1)

    @pl.when(j == 0)
    def _init():
        m_scr[...] = jnp.full_like(m_scr, -jnp.inf)
        l_scr[...] = jnp.zeros_like(l_scr)

    logits = (
        jnp.dot(x_ref[...], w_ref[...], preferred_element_type=jnp.float32)
        + b_ref[...]
    )

    start = pl.multiple_of(j * tn, tn)  # lane-tile aligned (tn % 128 == 0)
    o_ref[:, pl.ds(start, tn)] = logits.astype(o_ref.dtype)

    m_prev = m_scr[...]
    m_new = jnp.maximum(m_prev, jnp.max(logits, axis=-1, keepdims=True))
    l_scr[...] = l_scr[...] * jnp.exp(m_prev - m_new) + jnp.sum(
        jnp.exp(logits - m_new), axis=-1, keepdims=True
    )
    m_scr[...] = m_new

    @pl.when(j == n_vocab_tiles - 1)
    def _finalize():
        lse = m_scr[...] + jnp.log(l_scr[...])
        o_ref[...] = (o_ref[...].astype(jnp.float32) - lse).astype(o_ref.dtype)


def _logits_lse_kernel(x_ref, w_ref, b_ref, logits_ref, lse_ref, m_scr, l_scr,
                       *, n_vocab_tiles):
    """Two-pass, pass 1: per-tile raw logits + per-row online log-sum-exp."""
    j = pl.program_id(1)

    @pl.when(j == 0)
    def _init():
        m_scr[...] = jnp.full_like(m_scr, -jnp.inf)
        l_scr[...] = jnp.zeros_like(l_scr)

    logits = (
        jnp.dot(x_ref[...], w_ref[...], preferred_element_type=jnp.float32)
        + b_ref[...]
    )
    logits_ref[...] = logits

    m_prev = m_scr[...]
    m_new = jnp.maximum(m_prev, jnp.max(logits, axis=-1, keepdims=True))
    l_scr[...] = l_scr[...] * jnp.exp(m_prev - m_new) + jnp.sum(
        jnp.exp(logits - m_new), axis=-1, keepdims=True
    )
    m_scr[...] = m_new

    @pl.when(j == n_vocab_tiles - 1)
    def _finalize():
        lse_ref[...] = m_scr[...] + jnp.log(l_scr[...])


def _normalize_kernel(logits_ref, lse_ref, o_ref):
    """Two-pass, pass 2: log-prob = logits - lse (elementwise, mem-bound)."""
    o_ref[...] = (logits_ref[...] - lse_ref[...]).astype(o_ref.dtype)


# --------------------------------------------------------------------------
# Wrapper
# --------------------------------------------------------------------------
def projector_forward(x, weight_t, bias, *, tm_max=768, tn_max=512,
                      compute_dtype=jnp.bfloat16, out_dtype=jnp.float32,
                      vmem_budget_frac=0.7, force_two_pass=False,
                      force_stream=False):
    """log_softmax(x @ weight_t + bias, axis=-1).

    x:        [batch, len, hidden]  float32
    weight_t: [hidden, vocab]       float32 (transposed nn.Linear weight)
    bias:     [vocab]               float32
    returns:  [batch, len, vocab]   `out_dtype` log-probabilities

    NOTE: matmul operands are cast to `compute_dtype` (bf16 by default); this
    deviates from the pure-f32 PyTorch module only by operand rounding.
    """
    batch, seq, hidden = x.shape
    hidden_w, vocab = weight_t.shape
    assert hidden == hidden_w
    assert bias.shape == (vocab,)
    assert tm_max % 16 == 0 and tn_max % 128 == 0

    M = batch * seq
    in_isz = jnp.dtype(compute_dtype).itemsize
    out_isz = jnp.dtype(out_dtype).itemsize

    # Vocab tiling: lane-dense tiles (multiple of 128); padded columns get a
    # -1e30 bias so they contribute exp(-huge) = 0 to the LSE.
    v128 = _round_up(vocab, 128)
    tn = min(tn_max, v128)
    v_pad = _round_up(v128, tn)
    nv = v_pad // tn

    # Explicit VMEM budgeting (64 MiB/TC on v7x, 128 MiB on v5e/v6e).
    vmem_cap = _detect_vmem_bytes()
    budget = int(vmem_budget_frac * vmem_cap)

    # Row tiles: multiples of 16 (bf16 sublane packing of the MXU LHS).
    m16 = _round_up(M, 16)
    tm_cap = min(tm_max, m16)

    # Conservative resident-VMEM estimates (2x buffering + f32 temporaries).
    def small_bytes(tm):
        return (2 * hidden * v_pad * in_isz      # resident weight
                + 2 * v_pad * 4                  # bias
                + 2 * tm * hidden * in_isz       # x tile (double-buffered)
                + 2 * tm * v_pad * out_isz       # output tile (double-buffered)
                + 3 * tm * v_pad * 4)            # f32 logits/exp temporaries

    def stream_bytes(tm):
        return (2 * tm * v_pad * out_isz         # resident output block
                + 2 * tm * hidden * in_isz       # x tile
                + 2 * hidden * tn * in_isz       # streamed weight tile
                + 2 * tn * 4                     # bias tile
                + 4 * tm * 4                     # LSE scratch (m, l)
                + 2 * tm * v_pad * 4)            # finalize read-modify-write temps

    def twopass_bytes(tm):
        return (2 * tm * tn * 4                  # logits output tile
                + 2 * tm * 4                     # lse output block
                + 2 * tm * hidden * in_isz       # x tile
                + 2 * hidden * tn * in_isz       # weight tile
                + 2 * tn * 4                     # bias tile
                + 4 * tm * 4                     # LSE scratch
                + 2 * tm * tn * 4)               # f32 temporaries

    tm_small = _choose_tm(lambda t: small_bytes(t) <= budget, tm_cap)
    tm_stream = _choose_tm(lambda t: stream_bytes(t) <= budget, tm_cap)
    tm_two = _choose_tm(lambda t: twopass_bytes(t) <= budget, tm_cap) or 16

    if force_two_pass:
        path = "two_pass"
    elif force_stream:
        path = "stream" if tm_stream is not None else "two_pass"
    elif tm_small is not None and tm_small >= min(tm_cap, 128):
        path = "small"
    elif tm_stream is not None and tm_stream >= min(tm_cap, 256):
        path = "stream"
    else:
        path = "two_pass"

    # Pad / cast operands shared by all paths.
    w = weight_t
    b = bias
    if v_pad != vocab:
        w = jnp.pad(w, ((0, 0), (0, v_pad - vocab)))
        b = jnp.pad(b, (0, v_pad - vocab), constant_values=_NEG_LARGE)
    wk = w.astype(compute_dtype)
    bk = b.reshape(1, v_pad).astype(jnp.float32)
    x2d = x.reshape(M, hidden)

    def _x_for(m_pad):
        xp = x2d if m_pad == M else jnp.pad(x2d, ((0, m_pad - M), (0, 0)))
        return xp.astype(compute_dtype)

    def run_small():
        tm = _maybe_split_rows(tm_small, m16)
        m_pad = _round_up(M, tm)
        return pl.pallas_call(
            _oneshot_kernel,
            out_shape=jax.ShapeDtypeStruct((m_pad, v_pad), out_dtype),
            grid_spec=pltpu.PrefetchScalarGridSpec(
                num_scalar_prefetch=0,
                grid=(m_pad // tm,),
                in_specs=[
                    pl.BlockSpec((tm, hidden), lambda i: (i, 0)),
                    # Constant block index -> weight DMA'd into VMEM once.
                    pl.BlockSpec((hidden, v_pad), lambda i: (0, 0)),
                    pl.BlockSpec((1, v_pad), lambda i: (0, 0)),
                ],
                out_specs=pl.BlockSpec((tm, v_pad), lambda i: (i, 0)),
            ),
            compiler_params=pltpu.CompilerParams(
                dimension_semantics=("parallel",),
                vmem_limit_bytes=_vmem_limit(small_bytes(tm), vmem_cap),
            ),
        )(_x_for(m_pad), wk, bk)

    def run_stream():
        tm = _maybe_split_rows(tm_stream, m16)
        m_pad = _round_up(M, tm)
        kernel = functools.partial(_stream_kernel, tn=tn, n_vocab_tiles=nv)
        return pl.pallas_call(
            kernel,
            out_shape=jax.ShapeDtypeStruct((m_pad, v_pad), out_dtype),
            grid_spec=pltpu.PrefetchScalarGridSpec(
                num_scalar_prefetch=0,
                grid=(m_pad // tm, nv),
                in_specs=[
                    # x tile: constant across the vocab sweep (no re-DMA per j).
                    pl.BlockSpec((tm, hidden), lambda i, j: (i, 0)),
                    # weight / bias tiles streamed over the vocab axis.
                    pl.BlockSpec((hidden, tn), lambda i, j: (0, j)),
                    pl.BlockSpec((1, tn), lambda i, j: (0, j)),
                ],
                # Output block resident across the vocab ("arbitrary") axis;
                # normalized in place on the last vocab step.
                out_specs=pl.BlockSpec((tm, v_pad), lambda i, j: (i, 0)),
                scratch_shapes=[pltpu.VMEM((tm, 1), jnp.float32),
                                pltpu.VMEM((tm, 1), jnp.float32)],
            ),
            compiler_params=pltpu.CompilerParams(
                dimension_semantics=("parallel", "arbitrary"),
                vmem_limit_bytes=_vmem_limit(stream_bytes(tm), vmem_cap),
            ),
        )(_x_for(m_pad), wk, bk)

    def run_two_pass():
        tm = _maybe_split_rows(tm_two, m16)
        m_pad = _round_up(M, tm)
        xk = _x_for(m_pad)

        k1 = functools.partial(_logits_lse_kernel, n_vocab_tiles=nv)
        logits, lse = pl.pallas_call(
            k1,
            out_shape=(jax.ShapeDtypeStruct((m_pad, v_pad), jnp.float32),
                       jax.ShapeDtypeStruct((m_pad, 1), jnp.float32)),
            grid_spec=pltpu.PrefetchScalarGridSpec(
                num_scalar_prefetch=0,
                grid=(m_pad // tm, nv),
                in_specs=[
                    pl.BlockSpec((tm, hidden), lambda i, j: (i, 0)),
                    pl.BlockSpec((hidden, tn), lambda i, j: (0, j)),
                    pl.BlockSpec((1, tn), lambda i, j: (0, j)),
                ],
                out_specs=[
                    # Per-tile, lane-dense output blocks (tm x tn).
                    pl.BlockSpec((tm, tn), lambda i, j: (i, j)),
                    # Per-row LSE, resident across the vocab sweep.
                    pl.BlockSpec((tm, 1), lambda i, j: (i, 0)),
                ],
                scratch_shapes=[pltpu.VMEM((tm, 1), jnp.float32),
                                pltpu.VMEM((tm, 1), jnp.float32)],
            ),
            compiler_params=pltpu.CompilerParams(
                dimension_semantics=("parallel", "arbitrary"),
                vmem_limit_bytes=_vmem_limit(twopass_bytes(tm), vmem_cap),
            ),
        )(xk, wk, bk)

        resident2 = 6 * tm * tn * 4 + 4 * tm * 4
        return pl.pallas_call(
            _normalize_kernel,
            out_shape=jax.ShapeDtypeStruct((m_pad, v_pad), out_dtype),
            grid_spec=pltpu.PrefetchScalarGridSpec(
                num_scalar_prefetch=0,
                grid=(m_pad // tm, nv),
                in_specs=[
                    pl.BlockSpec((tm, tn), lambda i, j: (i, j)),
                    pl.BlockSpec((tm, 1), lambda i, j: (i, 0)),
                ],
                out_specs=pl.BlockSpec((tm, tn), lambda i, j: (i, j)),
            ),
            compiler_params=pltpu.CompilerParams(
                dimension_semantics=("parallel", "parallel"),
                vmem_limit_bytes=_vmem_limit(resident2, vmem_cap),
            ),
        )(logits, lse)

    if path == "small":
        out2d = run_small()
    elif path == "stream":
        try:
            # Block inside the try so any lowering/compile problem with the
            # aligned dynamic lane-slice store surfaces here.
            out2d = jax.block_until_ready(run_stream())
        except Exception:
            # Fall back to the always-supported two-pass formulation.
            out2d = run_two_pass()
    else:
        out2d = run_two_pass()

    return out2d[:M, :vocab].reshape(batch, seq, vocab)


def _reference_bf16(x, weight_t, bias):
    b, s, h = x.shape
    logits = jnp.dot(
        x.reshape(-1, h).astype(jnp.bfloat16),
        weight_t.astype(jnp.bfloat16),
        preferred_element_type=jnp.float32,
    ) + bias
    return jax.nn.log_softmax(logits, axis=-1).reshape(b, s, weight_t.shape[1])


if __name__ == "__main__":
    # Small shapes consistent with the module's forward: [batch, len, hidden].
    batch, seq, hidden, vocab = 2, 8, 32, 128

    key = jax.random.PRNGKey(0)
    kx, kw, kb = jax.random.split(key, 3)

    # nn.Linear-style init: uniform(-1/sqrt(hidden), 1/sqrt(hidden)).
    bound = 1.0 / math.sqrt(hidden)
    weight_t = jax.random.uniform(
        kw, (hidden, vocab), minval=-bound, maxval=bound, dtype=jnp.float32
    )
    bias = jax.random.uniform(
        kb, (vocab,), minval=-bound, maxval=bound, dtype=jnp.float32
    )
    x = jax.random.normal(kx, (batch, seq, hidden), dtype=jnp.float32)

    # Default path (full weight fits VMEM -> one-shot fused kernel).
    out = jax.block_until_ready(projector_forward(x, weight_t, bias))
    assert out.shape == (batch, seq, vocab)
    assert bool(jnp.all(jnp.isfinite(out)))

    ref = _reference_bf16(x, weight_t, bias)
    assert jnp.allclose(out, ref, atol=2e-3, rtol=2e-3), float(
        jnp.max(jnp.abs(out - ref))
    )

    # Looser sanity check against pure-f32 PyTorch semantics
    # (difference is only bf16 operand rounding in the matmul).
    ref_f32 = jax.nn.log_softmax(
        jnp.einsum("blh,hv->blv", x, weight_t) + bias, axis=-1
    )
    assert jnp.allclose(out, ref_f32, atol=5e-2, rtol=5e-2)

    # Exercise the large-vocab paths at the same small shape.
    out_tp = jax.block_until_ready(
        projector_forward(x, weight_t, bias, force_two_pass=True)
    )
    assert jnp.allclose(out_tp, ref, atol=2e-3, rtol=2e-3)
    out_st = jax.block_until_ready(
        projector_forward(x, weight_t, bias, force_stream=True)
    )
    assert jnp.allclose(out_st, ref, atol=2e-3, rtol=2e-3)

    # Multi-vocab-tile case (tn=128 -> 3 tiles, vocab padded 300 -> 384):
    # exercises the online LSE across tiles and the -1e30 column padding.
    vocab2 = 300
    kw2, kb2 = jax.random.split(jax.random.PRNGKey(1), 2)
    weight2 = jax.random.uniform(
        kw2, (hidden, vocab2), minval=-bound, maxval=bound, dtype=jnp.float32
    )
    bias2 = jax.random.uniform(
        kb2, (vocab2,), minval=-bound, maxval=bound, dtype=jnp.float32
    )
    ref2 = _reference_bf16(x, weight2, bias2)

    out2_tp = jax.block_until_ready(
        projector_forward(x, weight2, bias2, tn_max=128, force_two_pass=True)
    )
    assert out2_tp.shape == (batch, seq, vocab2)
    assert jnp.allclose(out2_tp, ref2, atol=2e-3, rtol=2e-3)

    out2_st = jax.block_until_ready(
        projector_forward(x, weight2, bias2, tn_max=128, force_stream=True)
    )
    assert jnp.allclose(out2_st, ref2, atol=2e-3, rtol=2e-3)

    print("KERNEL_OK")
</pallas_src>

<mosaic_0001>
module attributes {stable_mosaic.version = 11 : i64} {
  func.func @_oneshot_kernel(%arg0: i32, %arg1: memref<16x32xbf16, #tpu.memory_space<vmem>>, %arg2: memref<32x128xbf16, #tpu.memory_space<vmem>>, %arg3: memref<1x128xf32, #tpu.memory_space<vmem>>, %arg4: memref<16x128xf32, #tpu.memory_space<vmem>>) attributes {dimension_semantics = [#tpu.dimension_semantics<parallel>], iteration_bounds = array<i64: 1>, scalar_prefetch = 0 : i64, scratch_operands = 0 : i64, tpu.core_type = #tpu.core_type<tc>, window_params = [{transform_indices = @transform_0, window_bounds = array<i64: 16, 32>}, {pipeline_mode = #tpu.pipeline_mode<synchronous>, transform_indices = @transform_1, window_bounds = array<i64: 32, 128>}, {pipeline_mode = #tpu.pipeline_mode<synchronous>, transform_indices = @transform_2, window_bounds = array<i64: 1, 128>}, {transform_indices = @transform_3, window_bounds = array<i64: 16, 128>}]} {
    %c0 = arith.constant 0 : index
    %c0_0 = arith.constant 0 : index
    %0 = vector.load %arg1[%c0, %c0_0] : memref<16x32xbf16, #tpu.memory_space<vmem>>, vector<16x32xbf16>
    %c0_1 = arith.constant 0 : index
    %c0_2 = arith.constant 0 : index
    %1 = vector.load %arg2[%c0_1, %c0_2] : memref<32x128xbf16, #tpu.memory_space<vmem>>, vector<32x128xbf16>
    %cst = arith.constant dense<0.000000e+00> : vector<16x128xf32>
    %2 = tpu.matmul %0, %1, %cst {dimension_numbers = #tpu.dot_dimension_numbers<[1], [0], [0], [1], [0, 0, 1, 1], [], []>} : vector<16x32xbf16>, vector<32x128xbf16>, vector<16x128xf32> -> vector<16x128xf32>
    %c0_3 = arith.constant 0 : index
    %c0_4 = arith.constant 0 : index
    %3 = vector.load %arg3[%c0_3, %c0_4] : memref<1x128xf32, #tpu.memory_space<vmem>>, vector<1x128xf32>
    %4 = vector.broadcast %3 : vector<1x128xf32> to vector<16x128xf32>
    %5 = arith.addf %2, %4 : vector<16x128xf32>
    %cst_5 = arith.constant dense<0xFF800000> : vector<16xf32>
    %6 = vector.multi_reduction <maximumf>, %5, %cst_5 [1] : vector<16x128xf32> to vector<16xf32>
    %7 = vector.shape_cast %6 : vector<16xf32> to vector<16x1xf32>
    %8 = vector.broadcast %7 : vector<16x1xf32> to vector<16x128xf32>
    %9 = arith.subf %5, %8 : vector<16x128xf32>
    %10 = math.exp %9 : vector<16x128xf32>
    %cst_6 = arith.constant dense<0.000000e+00> : vector<16xf32>
    %11 = vector.multi_reduction <add>, %10, %cst_6 [1] : vector<16x128xf32> to vector<16xf32>
    %12 = vector.shape_cast %11 : vector<16xf32> to vector<16x1xf32>
    %13 = math.log %12 : vector<16x1xf32>
    %14 = arith.addf %7, %13 : vector<16x1xf32>
    %15 = vector.broadcast %14 : vector<16x1xf32> to vector<16x128xf32>
    %16 = arith.subf %5, %15 : vector<16x128xf32>
    %c0_7 = arith.constant 0 : index
    %c0_8 = arith.constant 0 : index
    %17 = vector.load %arg4[%c0_7, %c0_8] : memref<16x128xf32, #tpu.memory_space<vmem>>, vector<16x128xf32>
    tpu.vector_store %arg4[%c0_7, %c0_8], %16 {strides = array<i32>} : memref<16x128xf32, #tpu.memory_space<vmem>>, vector<16x128xf32>,
    return
  }
  func.func @transform_0(%arg0: i32) -> (i32, i32) {
    %c0_i32 = arith.constant 0 : i32
    %c0_i32_0 = arith.constant 0 : i32
    return %arg0, %c0_i32 : i32, i32
  }
  func.func @transform_1(%arg0: i32) -> (i32, i32) {
    %c0_i32 = arith.constant 0 : i32
    %c0_i32_0 = arith.constant 0 : i32
    %c0_i32_1 = arith.constant 0 : i32
    return %c0_i32, %c0_i32_0 : i32, i32
  }
  func.func @transform_2(%arg0: i32) -> (i32, i32) {
    %c0_i32 = arith.constant 0 : i32
    %c0_i32_0 = arith.constant 0 : i32
    %c0_i32_1 = arith.constant 0 : i32
    return %c0_i32, %c0_i32_0 : i32, i32
  }
  func.func @transform_3(%arg0: i32) -> (i32, i32) {
    %c0_i32 = arith.constant 0 : i32
    %c0_i32_0 = arith.constant 0 : i32
    return %arg0, %c0_i32 : i32, i32
  }
}

</mosaic_0001>

<bundles_post_ra>
// kernel: tpu_custom_call.1
= control target key start
LH: loop header
LB: loop body
LE: loop exit
PB: predicated region body
PF: predicated region fallthrough
CT: control target
= control target key end

     0   :  { %8 = vsyncpa [#allocation3], 0  ;;  %s304_s0 = inlined_call_operand.hbm [shape: bf16[16,32], index: 0, kind: input, shape index: {}]   ;;  %s305_s1 = inlined_call_operand.hbm [shape: bf16[32,128], index: 1, kind: input, shape index: {}]   ;;  %s306_s2 = inlined_call_operand.vmem [shape: f32[1,128], index: 2, kind: input, shape index: {}]   ;;  %s307_s3 = inlined_call_operand.hbm [shape: f32[16,128], index: 3, kind: output, shape index: {}]  }
   0x1   :  { %9 = vsyncpa [#allocation6], 0 }
   0x2   :  { %10 = vsyncpa [#allocation4], 0  ;;  %s263_s12 = smov [#allocation2]  }
   0x3   :  { %s16_s13 = sshll.u32 %s263_s12, 4  ;;  %s17_s13 = int_to_ptr.vmem [resolvable:$true] %s16_s13 }
   0x4   :  { %s205_s14 = scalar_lea.vmem %s17_s13, 128  ;;  %p210_p1 = scmp.lt.s32.totalorder %s17_s13, %s17_s13 }
   0x5   :  { %p206_p0 = scmp.ne.s32.totalorder %s17_s13, %s205_s14  ;;  %p211_p2 = scmp.lt.s32.totalorder %s205_s14, %s205_s14 }
   0x7   :  { %p212_p3 = por %p211_p2, %p210_p1 }
   0x9   :  { %p213_p4 = pnand %p212_p3, %p206_p0 }
   0xb   :  { %216 = shalt.err (!%p213_p4)
}
   0xc   :  { %s264_s15 = smov 64   ;;  %s265_s16 = smov 4  }
   0xd   :  { %22 = dma.hbm_to_vmem [thread:$0]  %s304_s0, 128, %s17_s13, [#allocation3], %s264_s15, %s264_s15, %s265_s16  }
   0xe   :  { %s266_s19 = smov [#allocation5]  }
   0xf   :  { %s28_s20 = sshll.u32 %s266_s19, 4  ;;  %s29_s20 = int_to_ptr.vmem [resolvable:$true] %s28_s20 }
  0x10   :  { %s225_s21 = scalar_lea.vmem %s29_s20, 256  ;;  %p230_p6 = scmp.lt.s32.totalorder %s29_s20, %s29_s20 }
  0x11   :  { %p226_p5 = scmp.ne.s32.totalorder %s29_s20, %s225_s21  ;;  %p231_p7 = scmp.lt.s32.totalorder %s225_s21, %s225_s21 }
  0x13   :  { %p232_p8 = por %p231_p7, %p230_p6 }
  0x15   :  { %p233_p9 = pnand %p232_p8, %p226_p5 }
  0x17   :  { %236 = shalt.err (!%p233_p9)
}
  0x18   :  { %34 = dma.hbm_to_vmem [thread:$0]  %s305_s1, 256, %s29_s20, [#allocation6], %s264_s15, %s264_s15, %s265_s16  }
  0x19   :  { %257 = dma.done.wait [#allocation3], 128  }
  0x1a   :  { %258 = vsyncadd [#allocation3], 4294967168 }
  0x1b   :  { %259 = dma.done.wait [#allocation6], 256  }
  0x1c   :  { %260 = vsyncadd [#allocation6], 4294967040  ;;  %v267_v0 = vmov 0.0   ;;  %vm268_vm0 = vmmov 0   ;;  %v186_v1 = vld [vmem:[#allocation5 + $0x8] sm:$0xff]   ;;  %v187_v2 = vld [vmem:[#allocation5] sm:$0xff]  }
  0x1d   :  { %169 = vmatprep.subr.bf16.mxu0 %v267_v0  ;;  %173 = vmatprep.mubr.msk.bf16.mxu0 %vm268_vm0, %v267_v0  ;;  %v188_v3 = vld [vmem:[#allocation2] sm:$0xff]   ;;  %vm74_vm1 = vcmask 261120   ;;  %s269_s1 = smov [#allocation7]  }
  0x1e   :  { %170 = vmatpush3.bf16.msra.mxu0 %v186_v1  ;;  %v161_v4 = vld [vmem:[%s306_s2] ss:$0 sm:$0xff]  ;;  %s148_s2 = sshll.u32 %s269_s1, 4  ;;  %s149_s2 = int_to_ptr.vmem [resolvable:$true] %s148_s2 }
  0x1f   :  { %171 = vmatprep.subr.bf16.mxu0 %v267_v0  ;;  %s237_s25 = scalar_lea.vmem %s149_s2, 256  ;;  %p242_p11 = scmp.lt.s32.totalorder %s149_s2, %s149_s2 }
  0x20   :  { %p238_p10 = scmp.ne.s32.totalorder %s149_s2, %s237_s25  ;;  %p243_p12 = scmp.lt.s32.totalorder %s237_s25, %s237_s25 }
  0x22   :  { %172 = vmatpush3.bf16.msra.mxu0 %v187_v2  ;;  %p244_p13 = por %p243_p12, %p242_p11 }
  0x24   :  { %p245_p0 = pnand %p244_p13, %p238_p10 }
  0x25   :  { %174 = vmatmul.mubr.msk.bf16.vlgmr.msra.gmra.mxu0 %vm74_vm1, %v188_v3 }
  0xe5   :  { %v112_v5 = vpop.f32.mrf.mxu0 }
  0xe6   :  { %v113_v6 = vadd.f32 %v161_v4, %v112_v5 }
  0xe7   :  { %v175_v7 = vpop.f32.mrf.mxu0 }
  0xe8   :  { %119 = vmax.xlane.f32.xlu0 %v113_v6 }
  0xe9   :  { %v115_v8 = vpop.f32.mrf.mxu0 }
  0xea   :  { %v116_v9 = vadd.f32 %v161_v4, %v115_v8 }
  0xeb   :  { %v176_v10 = vpop.f32.mrf.mxu0 }
  0xec   :  { %121 = vmax.xlane.f32.xlu0 %v116_v9 }
 0x171   :  { %v120_v11 = vpop.xlane.xlu0 %119 }
 0x172   :  { %v123_v12 = vsub.f32 %v113_v6, %v120_v11 }
 0x174   :  { %v125_v13 = vmul.f32 1.442695, %v123_v12 }
 0x175   :  { %v122_v14 = vpop.xlane.xlu0 %121 }
 0x176   :  { %189 = vpow2.f32 %v125_v13  ;;  %v124_v15 = vsub.f32 %v116_v9, %v122_v14 }
 0x178   :  { %v127_v16 = vmul.f32 1.442695, %v124_v15 }
 0x17a   :  { %191 = vpow2.f32 %v127_v16 }
 0x183   :  { %v190_v17 = vpop.eup %189 }
 0x184   :  { %129 = vadd.xlane.f32.xlu1 %v190_v17 }
 0x187   :  { %v192_v18 = vpop.eup %191 }
 0x188   :  { %131 = vadd.xlane.f32.xlu1 %v192_v18 }
 0x20d   :  { %v130_v19 = vpop.xlane.xlu1 %129 }
 0x20e   :  { %193 = vlog2.f32 %v130_v19 }
 0x211   :  { %v132_v20 = vpop.xlane.xlu1 %131 }
 0x212   :  { %195 = vlog2.f32 %v132_v20 }
 0x21b   :  { %v194_v21 = vpop.eup %193 }
 0x21c   :  { %v134_v22 = vmul.f32 0.6931472, %v194_v21 }
 0x21e   :  { %v137_v23 = vadd.f32 %v134_v22, %v120_v11 }
 0x21f   :  { %v196_v24 = vpop.eup %195 }
 0x220   :  { %v139_v25 = vsub.f32 %v113_v6, %v137_v23  ;;  %v136_v26 = vmul.f32 0.6931472, %v196_v24 }
 0x222   :  { %141 = vst [vmem:[#allocation7] sm:$0xff] %v139_v25  ;;  %v138_v27 = vadd.f32 %v136_v26, %v122_v14 }
 0x224   :  { %v140_v28 = vsub.f32 %v116_v9, %v138_v27 }
 0x226   :  { %142 = vst [vmem:[#allocation7 + $0x8] sm:$0xff] %v140_v28 }
 0x227   :  { %248 = shalt.err (!%p245_p0)
}
 0x228   :  { %s270_s26 = smov 128   ;;  %s271_s27 = smov 8  }
 0x229   :  { %154 = dma.vmem_to_hbm [thread:$0]  %s149_s2, 256, %s307_s3, [#allocation4], %s270_s26, %s270_s26, %s271_s27  }
 0x22a   :  { %261 = dma.done.wait [#allocation4], 256  }
 0x22b   :  { %262 = vsyncadd [#allocation4], 4294967040 }
 0x22c   :  { %158 = vsyncpa [#allocation3], 1 }
 0x22d   :  { %159 = vsyncpa [#allocation6], 1 }
 0x22e   :  { %160 = vsyncpa [#allocation4], 1 }

</bundles_post_ra>
